<compile_context>
chip_gen: v5e
topology: v5e:2x2
jax: 0.10.0
libtpu: 0.0.40
codegen_flags: <defaults>
</compile_context>

<pallas_src>
import jax
import jax.numpy as jnp
from jax.experimental import pallas as pl
from jax.experimental.pallas import tpu as pltpu

IN_DIM = 14
HIDDEN = 100
OUT_DIM = 1

# Padded, (8,128)-aligned shapes used inside the kernel.
IN_PAD = 16      # 14  -> 16  (sublane-friendly K for layer 1)
HID_PAD = 128    # 100 -> 128 (lane/sublane multiple; do NOT pad further on v6e/v7x)
OUT_SUB = 8      # 1   -> 8   (sublane pad for the last MXU matmul; row 0 is real)

DEFAULT_TILE_B = 2048   # batch tile (lane dim of activations); sweep 1024-4096


def _round_up(x, m):
    return ((x + m - 1) // m) * m


def _cdiv(a, b):
    return -(-a // b)


def _mlp_kernel(x_ref, w1_ref, b1_ref, w2_ref, b2_ref, w3_ref, b3_ref,
                w4_ref, b4_ref, o_ref):
    """Activations are feature-major, i.e. (features, tile_b):

        h_l = relu(W_l^T @ h_{l-1} + b_l)

    Every layer is a single MXU matmul, no XLU transpose is needed anywhere, and
    the final result is a lane-dense (1, tile_b) row so the HBM writeback is
    4 B/row.  Layer 1 runs in f32 (accuracy on raw features, ~2% of FLOPs);
    layers 2-4 run bf16 on the MXU with f32 accumulation; bias adds / ReLUs stay
    f32 on the VPU (v5e has no bf16 VPU)."""
    xt = x_ref[...]                                                    # (IN_PAD, tile_b) f32

    h = jnp.dot(w1_ref[...], xt, preferred_element_type=jnp.float32)  # (HID_PAD, tile_b)
    h = jnp.maximum(h + b1_ref[...], 0.0)

    h = jnp.dot(w2_ref[...], h.astype(jnp.bfloat16),
                preferred_element_type=jnp.float32)
    h = jnp.maximum(h + b2_ref[...], 0.0)

    h = jnp.dot(w3_ref[...], h.astype(jnp.bfloat16),
                preferred_element_type=jnp.float32)
    h = jnp.maximum(h + b3_ref[...], 0.0)

    out = jnp.dot(w4_ref[...], h.astype(jnp.bfloat16),
                  preferred_element_type=jnp.float32)                 # (OUT_SUB, tile_b)
    o_ref[...] = (out[0:1, :] + b4_ref[...]).astype(o_ref.dtype)      # (1, tile_b)


def init_params(key):
    """Deterministic init mimicking PyTorch's default Linear init:
    U(-1/sqrt(fan_in), 1/sqrt(fan_in)) for both weight and bias.
    Weights stored as (in_features, out_features) == torch weight.T."""
    dims = [(IN_DIM, HIDDEN), (HIDDEN, HIDDEN), (HIDDEN, HIDDEN), (HIDDEN, OUT_DIM)]
    params = {}
    keys = jax.random.split(key, 2 * len(dims))
    for i, (fan_in, fan_out) in enumerate(dims):
        bound = 1.0 / (fan_in ** 0.5)
        w = jax.random.uniform(keys[2 * i], (fan_in, fan_out), jnp.float32,
                               minval=-bound, maxval=bound)
        b = jax.random.uniform(keys[2 * i + 1], (1, fan_out), jnp.float32,
                               minval=-bound, maxval=bound)
        params[f"w{i + 1}"] = w
        params[f"b{i + 1}"] = b
    return params


def pad_params(params):
    """Zero-pad + transpose weights/biases once on the host for the feature-major
    kernel.  Layer-1 weight stays f32 (accuracy); layers 2-4 are pre-cast to bf16
    (MXU inputs).  Biases are f32 columns (lane-broadcast inside the kernel)."""
    def pad_wt(w, rows, cols, dtype):
        wt = w.T  # (out_features, in_features)
        out = jnp.zeros((rows, cols), jnp.float32).at[:wt.shape[0], :wt.shape[1]].set(wt)
        return out.astype(dtype)

    def pad_bcol(b, rows):
        return jnp.zeros((rows, 1), jnp.float32).at[:b.shape[1], 0].set(b[0])

    return {
        "w1": pad_wt(params["w1"], HID_PAD, IN_PAD, jnp.float32),
        "b1": pad_bcol(params["b1"], HID_PAD),
        "w2": pad_wt(params["w2"], HID_PAD, HID_PAD, jnp.bfloat16),
        "b2": pad_bcol(params["b2"], HID_PAD),
        "w3": pad_wt(params["w3"], HID_PAD, HID_PAD, jnp.bfloat16),
        "b3": pad_bcol(params["b3"], HID_PAD),
        "w4": pad_wt(params["w4"], OUT_SUB, HID_PAD, jnp.bfloat16),
        "b4": params["b4"].reshape(1, 1).astype(jnp.float32),
    }


def _choose_tiling(B, max_tile=DEFAULT_TILE_B):
    """Pick (tile_b, b_pad): tile_b is a multiple of 128 (lane-dense blocks);
    >= 2 grid steps for large batches (both v7x TensorCores); tile size fitted
    to B so the last tile isn't mostly zero padding."""
    b128 = _round_up(max(B, 1), 128)
    if b128 <= 128:
        return 128, 128
    n = max(2, _cdiv(b128, max_tile))
    tile_b = _round_up(_cdiv(b128, n), 128)
    b_pad = _round_up(b128, tile_b)
    return tile_b, b_pad


def linear_net_forward(x, padded_params, *, tile_b=None):
    """x: (B, IN_DIM) f32.  padded_params: output of pad_params()."""
    B = x.shape[0]
    if tile_b is None:
        tile_b, b_pad = _choose_tiling(B)
    else:
        tile_b = _round_up(tile_b, 128)
        b_pad = _round_up(max(B, 1), tile_b)
    grid = (b_pad // tile_b,)

    # Feature-major, zero-padded input (IN_PAD, b_pad); padded rows/cols are 0,
    # which passes through the zero-padded weights/biases without contamination.
    x_t = jnp.zeros((IN_PAD, b_pad), jnp.float32).at[:IN_DIM, :B].set(x.T)

    p = padded_params
    args = (x_t, p["w1"], p["b1"], p["w2"], p["b2"],
            p["w3"], p["b3"], p["w4"], p["b4"])

    def resident(shape):
        # Weights/biases stay VMEM-resident across all grid steps.
        return pl.BlockSpec(shape, lambda i: (0, 0))

    in_specs = [
        pl.BlockSpec((IN_PAD, tile_b), lambda i: (0, i)),      # x tile (pipelined)
        resident((HID_PAD, IN_PAD)),  resident((HID_PAD, 1)),  # w1^T, b1
        resident((HID_PAD, HID_PAD)), resident((HID_PAD, 1)),  # w2^T, b2
        resident((HID_PAD, HID_PAD)), resident((HID_PAD, 1)),  # w3^T, b3
        resident((OUT_SUB, HID_PAD)), resident((1, 1)),        # w4^T, b4
    ]
    out_specs = pl.BlockSpec((1, tile_b), lambda i: (0, i))    # lane-dense output row

    flops = 2 * b_pad * (IN_PAD * HID_PAD + 2 * HID_PAD * HID_PAD + HID_PAD * OUT_SUB)
    param_bytes = sum(int(v.size) * v.dtype.itemsize for v in p.values())
    bytes_accessed = int(x_t.size) * 4 + b_pad * 4 + param_bytes

    out_row = pl.pallas_call(
        _mlp_kernel,
        out_shape=jax.ShapeDtypeStruct((1, b_pad), jnp.float32),
        grid=grid,
        in_specs=in_specs,
        out_specs=out_specs,
        compiler_params=pltpu.CompilerParams(
            dimension_semantics=("parallel",)),
        cost_estimate=pl.CostEstimate(
            flops=flops, transcendentals=0, bytes_accessed=bytes_accessed),
    )(*args)

    return out_row[0, :B].reshape(B, OUT_DIM)


def _reference_forward(x, p):
    """Pure-JAX f32 reference matching the PyTorch module."""
    h = jnp.maximum(x @ p["w1"] + p["b1"], 0.0)
    h = jnp.maximum(h @ p["w2"] + p["b2"], 0.0)
    h = jnp.maximum(h @ p["w3"] + p["b3"], 0.0)
    return h @ p["w4"] + p["b4"]


if __name__ == "__main__":
    key = jax.random.PRNGKey(0)
    k_params, k_x = jax.random.split(key)
    params = init_params(k_params)
    padded = pad_params(params)

    batch = 8
    x = jax.random.normal(k_x, (batch, IN_DIM), jnp.float32)

    out = linear_net_forward(x, padded)
    out = jax.block_until_ready(out)

    ref = _reference_forward(x, params)
    assert out.shape == (batch, OUT_DIM)
    # Layers 2-4 use bf16 MXU inputs with f32 accumulation -> loosened tolerance.
    assert jnp.allclose(out, ref, atol=2e-2, rtol=2e-2), (
        f"max abs err = {jnp.max(jnp.abs(out - ref))}")

    print("KERNEL_OK")
</pallas_src>

<mosaic_0001>
module attributes {stable_mosaic.version = 11 : i64} {
  func.func @_mlp_kernel(%arg0: i32, %arg1: memref<16x128xf32, #tpu.memory_space<vmem>>, %arg2: memref<128x16xf32, #tpu.memory_space<vmem>>, %arg3: memref<128x1xf32, #tpu.memory_space<vmem>>, %arg4: memref<128x128xbf16, #tpu.memory_space<vmem>>, %arg5: memref<128x1xf32, #tpu.memory_space<vmem>>, %arg6: memref<128x128xbf16, #tpu.memory_space<vmem>>, %arg7: memref<128x1xf32, #tpu.memory_space<vmem>>, %arg8: memref<8x128xbf16, #tpu.memory_space<vmem>>, %arg9: memref<1x1xf32, #tpu.memory_space<vmem>>, %arg10: memref<1x128xf32, #tpu.memory_space<vmem>>) attributes {dimension_semantics = [#tpu.dimension_semantics<parallel>], iteration_bounds = array<i64: 1>, scalar_prefetch = 0 : i64, scratch_operands = 0 : i64, tpu.core_type = #tpu.core_type<tc>, window_params = [{transform_indices = @transform_0, window_bounds = array<i64: 16, 128>}, {pipeline_mode = #tpu.pipeline_mode<synchronous>, transform_indices = @transform_1, window_bounds = array<i64: 128, 16>}, {pipeline_mode = #tpu.pipeline_mode<synchronous>, transform_indices = @transform_2, window_bounds = array<i64: 128, 1>}, {pipeline_mode = #tpu.pipeline_mode<synchronous>, transform_indices = @transform_3, window_bounds = array<i64: 128, 128>}, {pipeline_mode = #tpu.pipeline_mode<synchronous>, transform_indices = @transform_4, window_bounds = array<i64: 128, 1>}, {pipeline_mode = #tpu.pipeline_mode<synchronous>, transform_indices = @transform_5, window_bounds = array<i64: 128, 128>}, {pipeline_mode = #tpu.pipeline_mode<synchronous>, transform_indices = @transform_6, window_bounds = array<i64: 128, 1>}, {pipeline_mode = #tpu.pipeline_mode<synchronous>, transform_indices = @transform_7, window_bounds = array<i64: 8, 128>}, {pipeline_mode = #tpu.pipeline_mode<synchronous>, transform_indices = @transform_8, window_bounds = array<i64: 1, 1>}, {transform_indices = @transform_9, window_bounds = array<i64: 1, 128>}]} {
    %c0 = arith.constant 0 : index
    %c0_0 = arith.constant 0 : index
    %0 = vector.load %arg1[%c0, %c0_0] : memref<16x128xf32, #tpu.memory_space<vmem>>, vector<16x128xf32>
    %c0_1 = arith.constant 0 : index
    %c0_2 = arith.constant 0 : index
    %1 = vector.load %arg2[%c0_1, %c0_2] : memref<128x16xf32, #tpu.memory_space<vmem>>, vector<128x16xf32>
    %cst = arith.constant dense<0.000000e+00> : vector<128x128xf32>
    %2 = tpu.matmul %1, %0, %cst {dimension_numbers = #tpu.dot_dimension_numbers<[1], [0], [0], [1], [0, 0, 1, 1], [], []>} : vector<128x16xf32>, vector<16x128xf32>, vector<128x128xf32> -> vector<128x128xf32>
    %c0_3 = arith.constant 0 : index
    %c0_4 = arith.constant 0 : index
    %3 = vector.load %arg3[%c0_3, %c0_4] : memref<128x1xf32, #tpu.memory_space<vmem>>, vector<128x1xf32>
    %4 = vector.broadcast %3 : vector<128x1xf32> to vector<128x128xf32>
    %5 = arith.addf %2, %4 : vector<128x128xf32>
    %cst_5 = arith.constant 0.000000e+00 : f32
    %6 = vector.broadcast %cst_5 : f32 to vector<128x128xf32>
    %7 = arith.maximumf %5, %6 : vector<128x128xf32>
    %c0_6 = arith.constant 0 : index
    %c0_7 = arith.constant 0 : index
    %8 = vector.load %arg4[%c0_6, %c0_7] : memref<128x128xbf16, #tpu.memory_space<vmem>>, vector<128x128xbf16>
    %9 = arith.truncf %7 : vector<128x128xf32> to vector<128x128xbf16>
    %cst_8 = arith.constant dense<0.000000e+00> : vector<128x128xf32>
    %10 = tpu.matmul %8, %9, %cst_8 {dimension_numbers = #tpu.dot_dimension_numbers<[1], [0], [0], [1], [0, 0, 1, 1], [], []>} : vector<128x128xbf16>, vector<128x128xbf16>, vector<128x128xf32> -> vector<128x128xf32>
    %c0_9 = arith.constant 0 : index
    %c0_10 = arith.constant 0 : index
    %11 = vector.load %arg5[%c0_9, %c0_10] : memref<128x1xf32, #tpu.memory_space<vmem>>, vector<128x1xf32>
    %12 = vector.broadcast %11 : vector<128x1xf32> to vector<128x128xf32>
    %13 = arith.addf %10, %12 : vector<128x128xf32>
    %cst_11 = arith.constant 0.000000e+00 : f32
    %14 = vector.broadcast %cst_11 : f32 to vector<128x128xf32>
    %15 = arith.maximumf %13, %14 : vector<128x128xf32>
    %c0_12 = arith.constant 0 : index
    %c0_13 = arith.constant 0 : index
    %16 = vector.load %arg6[%c0_12, %c0_13] : memref<128x128xbf16, #tpu.memory_space<vmem>>, vector<128x128xbf16>
    %17 = arith.truncf %15 : vector<128x128xf32> to vector<128x128xbf16>
    %cst_14 = arith.constant dense<0.000000e+00> : vector<128x128xf32>
    %18 = tpu.matmul %16, %17, %cst_14 {dimension_numbers = #tpu.dot_dimension_numbers<[1], [0], [0], [1], [0, 0, 1, 1], [], []>} : vector<128x128xbf16>, vector<128x128xbf16>, vector<128x128xf32> -> vector<128x128xf32>
    %c0_15 = arith.constant 0 : index
    %c0_16 = arith.constant 0 : index
    %19 = vector.load %arg7[%c0_15, %c0_16] : memref<128x1xf32, #tpu.memory_space<vmem>>, vector<128x1xf32>
    %20 = vector.broadcast %19 : vector<128x1xf32> to vector<128x128xf32>
    %21 = arith.addf %18, %20 : vector<128x128xf32>
    %cst_17 = arith.constant 0.000000e+00 : f32
    %22 = vector.broadcast %cst_17 : f32 to vector<128x128xf32>
    %23 = arith.maximumf %21, %22 : vector<128x128xf32>
    %c0_18 = arith.constant 0 : index
    %c0_19 = arith.constant 0 : index
    %24 = vector.load %arg8[%c0_18, %c0_19] : memref<8x128xbf16, #tpu.memory_space<vmem>>, vector<8x128xbf16>
    %25 = arith.truncf %23 : vector<128x128xf32> to vector<128x128xbf16>
    %cst_20 = arith.constant dense<0.000000e+00> : vector<8x128xf32>
    %26 = tpu.matmul %24, %25, %cst_20 {dimension_numbers = #tpu.dot_dimension_numbers<[1], [0], [0], [1], [0, 0, 1, 1], [], []>} : vector<8x128xbf16>, vector<128x128xbf16>, vector<8x128xf32> -> vector<8x128xf32>
    %27 = vector.extract_strided_slice %26 {offsets = [0, 0], sizes = [1, 128], strides = [1, 1]} : vector<8x128xf32> to vector<1x128xf32>
    %c0_21 = arith.constant 0 : index
    %c0_22 = arith.constant 0 : index
    %28 = vector.load %arg9[%c0_21, %c0_22] : memref<1x1xf32, #tpu.memory_space<vmem>>, vector<1x1xf32>
    %29 = vector.broadcast %28 : vector<1x1xf32> to vector<1x128xf32>
    %30 = arith.addf %27, %29 : vector<1x128xf32>
    %c0_23 = arith.constant 0 : index
    %c0_24 = arith.constant 0 : index
    %31 = vector.load %arg10[%c0_23, %c0_24] : memref<1x128xf32, #tpu.memory_space<vmem>>, vector<1x128xf32>
    tpu.vector_store %arg10[%c0_23, %c0_24], %30 {strides = array<i32>} : memref<1x128xf32, #tpu.memory_space<vmem>>, vector<1x128xf32>,
    return
  }
  func.func @transform_0(%arg0: i32) -> (i32, i32) {
    %c0_i32 = arith.constant 0 : i32
    %c0_i32_0 = arith.constant 0 : i32
    return %c0_i32, %arg0 : i32, i32
  }
  func.func @transform_1(%arg0: i32) -> (i32, i32) {
    %c0_i32 = arith.constant 0 : i32
    %c0_i32_0 = arith.constant 0 : i32
    %c0_i32_1 = arith.constant 0 : i32
    return %c0_i32, %c0_i32_0 : i32, i32
  }
  func.func @transform_2(%arg0: i32) -> (i32, i32) {
    %c0_i32 = arith.constant 0 : i32
    %c0_i32_0 = arith.constant 0 : i32
    %c0_i32_1 = arith.constant 0 : i32
    return %c0_i32, %c0_i32_0 : i32, i32
  }
  func.func @transform_3(%arg0: i32) -> (i32, i32) {
    %c0_i32 = arith.constant 0 : i32
    %c0_i32_0 = arith.constant 0 : i32
    %c0_i32_1 = arith.constant 0 : i32
    return %c0_i32, %c0_i32_0 : i32, i32
  }
  func.func @transform_4(%arg0: i32) -> (i32, i32) {
    %c0_i32 = arith.constant 0 : i32
    %c0_i32_0 = arith.constant 0 : i32
    %c0_i32_1 = arith.constant 0 : i32
    return %c0_i32, %c0_i32_0 : i32, i32
  }
  func.func @transform_5(%arg0: i32) -> (i32, i32) {
    %c0_i32 = arith.constant 0 : i32
    %c0_i32_0 = arith.constant 0 : i32
    %c0_i32_1 = arith.constant 0 : i32
    return %c0_i32, %c0_i32_0 : i32, i32
  }
  func.func @transform_6(%arg0: i32) -> (i32, i32) {
    %c0_i32 = arith.constant 0 : i32
    %c0_i32_0 = arith.constant 0 : i32
    %c0_i32_1 = arith.constant 0 : i32
    return %c0_i32, %c0_i32_0 : i32, i32
  }
  func.func @transform_7(%arg0: i32) -> (i32, i32) {
    %c0_i32 = arith.constant 0 : i32
    %c0_i32_0 = arith.constant 0 : i32
    %c0_i32_1 = arith.constant 0 : i32
    return %c0_i32, %c0_i32_0 : i32, i32
  }
  func.func @transform_8(%arg0: i32) -> (i32, i32) {
    %c0_i32 = arith.constant 0 : i32
    %c0_i32_0 = arith.constant 0 : i32
    %c0_i32_1 = arith.constant 0 : i32
    return %c0_i32, %c0_i32_0 : i32, i32
  }
  func.func @transform_9(%arg0: i32) -> (i32, i32) {
    %c0_i32 = arith.constant 0 : i32
    %c0_i32_0 = arith.constant 0 : i32
    return %c0_i32, %arg0 : i32, i32
  }
}

</mosaic_0001>

<bundles_post_ra>
// kernel: tpu_custom_call.1
= control target key start
LH: loop header
LB: loop body
LE: loop exit
PB: predicated region body
PF: predicated region fallthrough
CT: control target
= control target key end

     0   :  { %s1271_s0 = inlined_call_operand.vmem [shape: f32[16,128], index: 0, kind: input, shape index: {}]   ;;  %s1272_s1 = inlined_call_operand.vmem [shape: f32[128,16], index: 1, kind: input, shape index: {}]   ;;  %s1273_s2 = inlined_call_operand.vmem [shape: f32[128,1], index: 2, kind: input, shape index: {}]   ;;  %s1274_s3 = inlined_call_operand.vmem [shape: bf16[128,128], index: 3, kind: input, shape index: {}]   ;;  %s1275_s4 = inlined_call_operand.vmem [shape: f32[128,1], index: 4, kind: input, shape index: {}]   ;;  %s1276_s5 = inlined_call_operand.vmem [shape: bf16[128,128], index: 5, kind: input, shape index: {}]   ;;  %s1277_s6 = inlined_call_operand.vmem [shape: f32[128,1], index: 6, kind: input, shape index: {}]   ;;  %s1278_s7 = inlined_call_operand.vmem [shape: bf16[8,128], index: 7, kind: input, shape index: {}]   ;;  %s1279_s8 = inlined_call_operand.<no memory space> [shape: f32[1,1], index: 8, kind: input, shape index: {}]   ;;  %s1280_s9 = inlined_call_operand.hbm [shape: f32[1,128], index: 9, kind: output, shape index: {}]  }
   0x1   :  { %v14_v0 = vstv %s1279_s8 }
   0x2   :  { %15 = vst [vmem:[#allocation2] sm:$0x1] %v14_v0 }
   0x3   :  { %v36_v1 = vld [vmem:[%s1271_s0 + $0x8] sm:$0xff]  ;;  %v67_v2 = vld [vmem:[%s1273_s2 + $0x70] sm:$0xff]  ;;  %v35_v3 = vld [vmem:[%s1271_s0] sm:$0xff]  ;;  %v935_v4 = vmov 0   ;;  %vm149_vm0 = vcmask 130048  }
   0x4   :  { %906 = vset.pattern.permute.xlu0 %v935_v4  ;;  %212 = vmatpush.msra.mxu0 %v36_v1  ;;  %v37_v5 = vld [vmem:[%s1272_s1] sm:$0xff]  ;;  %v63_v7 = vld [vmem:[%s1273_s2 + $0x50] sm:$0xff]  ;;  %v68_v8 = vld [vmem:[%s1273_s2 + $0x78] sm:$0xff] }
   0x5   :  { %v65_v6 = vld [vmem:[%s1273_s2 + $0x60] sm:$0xff]  ;;  %141 = vperm.xlu0 %906, %v67_v2   ;;  %908 = vset.pattern.permute.xlu2 %v935_v4 }
   0x6   :  { %213 = vmatpush.msra.mxu0 %v35_v3  ;;  %907 = vset.pattern.permute.xlu1 %v935_v4 }
   0x7   :  { %792 = vmatmul.msk.f32.vlgmr.msra.gmra.mxu0 %vm149_vm0, %v37_v5  ;;  %131 = vperm.xlu1 %907, %v65_v6  }
   0x8   :  { %121 = vperm.xlu2 %908, %v63_v7  }
   0x9   :  { %16 = vsyncpa [#allocation4], 0  ;;  %v38_v9 = vld [vmem:[%s1272_s1 + $0x8] sm:$0xff]  ;;  %v64_v11 = vld [vmem:[%s1273_s2 + $0x58] sm:$0xff]  ;;  %s936_s23 = smov [#allocation3]   ;;  %s783_s27 = sshll.u32 %s1280_s9, 4  ;;  %s784_s27 = int_to_ptr.hbm [resolvable:$true] %s783_s27 }
   0xa   :  { %v66_v10 = vld [vmem:[%s1273_s2 + $0x68] sm:$0xff]  ;;  %v61_v12 = vld [vmem:[%s1273_s2 + $0x40] sm:$0xff]  ;;  %v39_v13 = vld [vmem:[%s1272_s1 + $0x10] sm:$0xff]  ;;  %s781_s24 = sshll.u32 %s936_s23, 4  ;;  %s782_s24 = int_to_ptr.vmem [resolvable:$true] %s781_s24 }
   0xb   :  { %v62_v14 = vld [vmem:[%s1273_s2 + $0x48] sm:$0xff]  ;;  %v59_v15 = vld [vmem:[%s1273_s2 + $0x30] sm:$0xff]  ;;  %v60_v16 = vld [vmem:[%s1273_s2 + $0x38] sm:$0xff] }
   0xc   :  { %v40_v17 = vld [vmem:[%s1272_s1 + $0x18] sm:$0xff]  ;;  %v57_v18 = vld [vmem:[%s1273_s2 + $0x20] sm:$0xff]  ;;  %v58_v19 = vld [vmem:[%s1273_s2 + $0x28] sm:$0xff] }
   0xd   :  { %146 = vperm.xlu0 %906, %v68_v8   ;;  %v55_v20 = vld [vmem:[%s1273_s2 + $0x10] sm:$0xff]  ;;  %v41_v21 = vld [vmem:[%s1272_s1 + $0x20] sm:$0xff]  ;;  %v56_v22 = vld [vmem:[%s1273_s2 + $0x18] sm:$0xff] }
   0xe   :  { %v53_v23 = vld [vmem:[%s1273_s2] sm:$0xff]  ;;  %v54_v24 = vld [vmem:[%s1273_s2 + $0x8] sm:$0xff]  ;;  %v317_v26 = vld [vmem:[%s1275_s4 + $0x70] sm:$0xff] }
   0xf   :  { %793 = vmatmul.msk.f32.gmra.mxu0 %vm149_vm0, %v38_v9  ;;  %136 = vperm.xlu1 %907, %v66_v10   ;;  %v42_v25 = vld [vmem:[%s1272_s1 + $0x28] sm:$0xff]  ;;  %v318_v27 = vld [vmem:[%s1275_s4 + $0x78] sm:$0xff]  ;;  %v315_v28 = vld [vmem:[%s1275_s4 + $0x60] sm:$0xff] }
  0x10   :  { %126 = vperm.xlu2 %908, %v64_v11   ;;  %v43_v29 = vld [vmem:[%s1272_s1 + $0x30] sm:$0xff]  ;;  %v316_v30 = vld [vmem:[%s1275_s4 + $0x68] sm:$0xff]  ;;  %v314_v32 = vld [vmem:[%s1275_s4 + $0x58] sm:$0xff] }
  0x11   :  { %v313_v31 = vld [vmem:[%s1275_s4 + $0x50] sm:$0xff]  ;;  %v44_v33 = vld [vmem:[%s1272_s1 + $0x38] sm:$0xff]  ;;  %v311_v34 = vld [vmem:[%s1275_s4 + $0x40] sm:$0xff] }
  0x12   :  { %v312_v35 = vld [vmem:[%s1275_s4 + $0x48] sm:$0xff]  ;;  %v309_v36 = vld [vmem:[%s1275_s4 + $0x30] sm:$0xff]  ;;  %v45_v37 = vld [vmem:[%s1272_s1 + $0x40] sm:$0xff] }
  0x13   :  { %v310_v38 = vld [vmem:[%s1275_s4 + $0x38] sm:$0xff]  ;;  %v307_v39 = vld [vmem:[%s1275_s4 + $0x20] sm:$0xff]  ;;  %v308_v40 = vld [vmem:[%s1275_s4 + $0x28] sm:$0xff] }
  0x14   :  { %v46_v41 = vld [vmem:[%s1272_s1 + $0x48] sm:$0xff]  ;;  %v305_v42 = vld [vmem:[%s1275_s4 + $0x10] sm:$0xff]  ;;  %v306_v43 = vld [vmem:[%s1275_s4 + $0x18] sm:$0xff] }
  0x15   :  { %111 = vperm.xlu0 %906, %v61_v12   ;;  %v303_v44 = vld [vmem:[%s1275_s4] sm:$0xff]  ;;  %v47_v45 = vld [vmem:[%s1272_s1 + $0x50] sm:$0xff]  ;;  %v304_v46 = vld [vmem:[%s1275_s4 + $0x8] sm:$0xff] }
  0x16   :  { %v550_v47 = vld [vmem:[%s1277_s6 + $0x70] sm:$0xff]  ;;  %v551_v48 = vld [vmem:[%s1277_s6 + $0x78] sm:$0xff]  ;;  %v548_v50 = vld [vmem:[%s1277_s6 + $0x60] sm:$0xff] }
  0x17   :  { %794 = vmatmul.msk.f32.gmra.mxu0 %vm149_vm0, %v39_v13  ;;  %116 = vperm.xlu1 %907, %v62_v14   ;;  %v48_v49 = vld [vmem:[%s1272_s1 + $0x58] sm:$0xff]  ;;  %v549_v51 = vld [vmem:[%s1277_s6 + $0x68] sm:$0xff]  ;;  %v546_v52 = vld [vmem:[%s1277_s6 + $0x50] sm:$0xff] }
  0x18   :  { %101 = vperm.xlu2 %908, %v59_v15   ;;  %v49_v53 = vld [vmem:[%s1272_s1 + $0x60] sm:$0xff]  ;;  %v547_v54 = vld [vmem:[%s1277_s6 + $0x58] sm:$0xff]  ;;  %v545_v56 = vld [vmem:[%s1277_s6 + $0x48] sm:$0xff] }
  0x19   :  { %v544_v55 = vld [vmem:[%s1277_s6 + $0x40] sm:$0xff]  ;;  %v50_v57 = vld [vmem:[%s1272_s1 + $0x68] sm:$0xff]  ;;  %v542_v58 = vld [vmem:[%s1277_s6 + $0x30] sm:$0xff] }
  0x1a   :  { %v543_v59 = vld [vmem:[%s1277_s6 + $0x38] sm:$0xff]  ;;  %v540_v60 = vld [vmem:[%s1277_s6 + $0x20] sm:$0xff]  ;;  %v51_v62 = vld [vmem:[%s1272_s1 + $0x70] sm:$0xff] }
  0x1b   :  { %v541_v63 = vld [vmem:[%s1277_s6 + $0x28] sm:$0xff]  ;;  %v538_v0 = vld [vmem:[%s1277_s6 + $0x10] sm:$0xff]  ;;  %v539_v3 = vld [vmem:[%s1277_s6 + $0x18] sm:$0xff] }
  0x1c   :  { %v52_v4 = vld [vmem:[%s1272_s1 + $0x78] sm:$0xff]  ;;  %v536_v5 = vld [vmem:[%s1277_s6] sm:$0xff]  ;;  %v537_v7 = vld [vmem:[%s1277_s6 + $0x8] sm:$0xff] }
  0x1d   :  { %106 = vperm.xlu0 %906, %v60_v16   ;;  %v767_v10 = vld [vmem:[#allocation2] sm:$0x1] }
  0x1f   :  { %795 = vmatmul.msk.f32.gmra.mxu0 %vm149_vm0, %v40_v17  ;;  %91 = vperm.xlu1 %907, %v57_v18  }
  0x20   :  { %96 = vperm.xlu2 %908, %v58_v19  }
  0x25   :  { %81 = vperm.xlu0 %906, %v55_v20  }
  0x27   :  { %796 = vmatmul.msk.f32.gmra.mxu0 %vm149_vm0, %v41_v21  ;;  %86 = vperm.xlu1 %907, %v56_v22  }
  0x28   :  { %71 = vperm.xlu2 %908, %v53_v23  }
  0x2d   :  { %76 = vperm.xlu0 %906, %v54_v24  }
  0x2f   :  { %797 = vmatmul.msk.f32.gmra.mxu0 %vm149_vm0, %v42_v25  ;;  %391 = vperm.xlu1 %907, %v317_v26  }
  0x30   :  { %396 = vperm.xlu2 %908, %v318_v27  }
  0x35   :  { %381 = vperm.xlu0 %906, %v315_v28  }
  0x37   :  { %798 = vmatmul.msk.f32.gmra.mxu0 %vm149_vm0, %v43_v29  ;;  %386 = vperm.xlu1 %907, %v316_v30  }
  0x38   :  { %371 = vperm.xlu2 %908, %v313_v31  }
  0x3d   :  { %376 = vperm.xlu0 %906, %v314_v32  }
  0x3f   :  { %799 = vmatmul.msk.f32.gmra.mxu0 %vm149_vm0, %v44_v33  ;;  %361 = vperm.xlu1 %907, %v311_v34  }
  0x40   :  { %366 = vperm.xlu2 %908, %v312_v35  }
  0x45   :  { %351 = vperm.xlu0 %906, %v309_v36  }
  0x47   :  { %800 = vmatmul.msk.f32.gmra.mxu0 %vm149_vm0, %v45_v37  ;;  %356 = vperm.xlu1 %907, %v310_v38  }
  0x48   :  { %341 = vperm.xlu2 %908, %v307_v39  }
  0x4d   :  { %346 = vperm.xlu0 %906, %v308_v40  }
  0x4f   :  { %801 = vmatmul.msk.f32.gmra.mxu0 %vm149_vm0, %v46_v41  ;;  %331 = vperm.xlu1 %907, %v305_v42  }
  0x50   :  { %336 = vperm.xlu2 %908, %v306_v43  }
  0x55   :  { %321 = vperm.xlu0 %906, %v303_v44  }
  0x57   :  { %802 = vmatmul.msk.f32.gmra.mxu0 %vm149_vm0, %v47_v45  ;;  %326 = vperm.xlu1 %907, %v304_v46  }
  0x58   :  { %624 = vperm.xlu2 %908, %v550_v47  }
  0x5d   :  { %629 = vperm.xlu0 %906, %v551_v48  }
  0x5f   :  { %803 = vmatmul.msk.f32.gmra.mxu0 %vm149_vm0, %v48_v49  ;;  %614 = vperm.xlu1 %907, %v548_v50  }
  0x60   :  { %619 = vperm.xlu2 %908, %v549_v51  }
  0x62   :  { %v1181_v61 = vpop.permute.xlu2 %121 }
  0x65   :  { %604 = vperm.xlu0 %906, %v546_v52  }
  0x67   :  { %804 = vmatmul.msk.f32.gmra.mxu0 %vm149_vm0, %v49_v53  ;;  %609 = vperm.xlu1 %907, %v547_v54  }
  0x68   :  { %594 = vperm.xlu2 %908, %v544_v55  }
  0x6a   :  { %v127_v6 = vpop.permute.xlu2 %126 }
  0x6d   :  { %599 = vperm.xlu0 %906, %v545_v56  }
  0x6f   :  { %805 = vmatmul.msk.f32.gmra.mxu0 %vm149_vm0, %v50_v57  ;;  %584 = vperm.xlu1 %907, %v542_v58  }
  0x70   :  { %589 = vperm.xlu2 %908, %v543_v59  }
  0x72   :  { %v102_v12 = vpop.permute.xlu2 %101 }
  0x75   :  { %574 = vperm.xlu0 %906, %v540_v60  }
  0x77   :  { %v1192_v1 = vpop.permute.xlu0 %141  ;;  %806 = vmatmul.msk.f32.gmra.mxu0 %vm149_vm0, %v51_v62  ;;  %579 = vperm.xlu1 %907, %v541_v63  }
  0x78   :  { %564 = vperm.xlu2 %908, %v538_v0  }
  0x79   :  { %v1195_v2 = vpop.permute.xlu1 %131 }
  0x7a   :  { %v97_v17 = vpop.permute.xlu2 %96 }
  0x7d   :  { %569 = vperm.xlu0 %906, %v539_v3  }
  0x7f   :  { %v147_v8 = vpop.permute.xlu0 %146  ;;  %807 = vmatmul.msk.f32.gmra.mxu0 %vm149_vm0, %v52_v4  ;;  %554 = vperm.xlu1 %907, %v536_v5  }
  0x80   :  { %559 = vperm.xlu2 %908, %v537_v7  }
  0x81   :  { %v137_v9 = vpop.permute.xlu1 %136 }
  0x82   :  { %v72_v22 = vpop.permute.xlu2 %71 }
  0x84   :  { %v215_v11 = vpop.f32.mrf.mxu0 }
  0x85   :  { %770 = vperm.xlu0 %906, %v767_v10   ;;  %v216_v26 = vadd.f32 %v215_v11, %v72_v22 }
  0x87   :  { %v112_v13 = vpop.permute.xlu0 %111  ;;  %v263_v32 = vmax.f32 %v216_v26, 0.0 }
  0x89   :  { %v117_v14 = vpop.permute.xlu1 %116 }
  0x8a   :  { %v397_v26 = vpop.permute.xlu2 %396 }
  0x8c   :  { %v218_v15 = vpop.f32.mrf.mxu0 }
  0x8f   :  { %v107_v16 = vpop.permute.xlu0 %106 }
  0x91   :  { %v92_v18 = vpop.permute.xlu1 %91 }
  0x94   :  { %v221_v19 = vpop.f32.mrf.mxu0 }
  0x97   :  { %v82_v20 = vpop.permute.xlu0 %81 }
  0x98   :  { %v222_v23 = vadd.f32 %v221_v19, %v82_v20  ;;  %v876_v19 = vld [vmem:[%s1274_s3 + $0x20] sm:$0xff]  ;;  %v877_v20 = vld [vmem:[%s1274_s3 + $0x28] sm:$0xff] }
  0x99   :  { %v87_v21 = vpop.permute.xlu1 %86 }
  0x9a   :  { %v265_v27 = vmax.f32 %v222_v23, 0.0 }
  0x9c   :  { %v224_v24 = vpop.f32.mrf.mxu0 }
  0x9d   :  { %v225_v25 = vadd.f32 %v224_v24, %v87_v21 }
  0x9f   :  { %v266_v28 = vmax.f32 %v225_v25, 0.0  ;;  %v77_v29 = vpop.permute.xlu0 %76 }
  0xa0   :  { %v219_v30 = vadd.f32 %v218_v15, %v77_v29  ;;  %v372_v29 = vpop.permute.xlu2 %371 }
  0xa1   :  { %v296_v31 = vpack.c.bf16 %v266_v28, %v265_v27  ;;  %v392_v21 = vpop.permute.xlu1 %391 }
  0xa2   :  { %v264_v33 = vmax.f32 %v219_v30, 0.0 }
  0xa4   :  { %v227_v34 = vpop.f32.mrf.mxu0  ;;  %v295_v35 = vpack.c.bf16 %v264_v33, %v263_v32 }
  0xa5   :  { %v228_v36 = vadd.f32 %v227_v34, %v92_v18  ;;  %v875_v18 = vld [vmem:[%s1274_s3 + $0x18] sm:$0xff] }
  0xa7   :  { %v267_v39 = vmax.f32 %v228_v36, 0.0  ;;  %v382_v22 = vpop.permute.xlu0 %381 }
  0xa8   :  { %v367_v33 = vpop.permute.xlu2 %366 }
  0xa9   :  { %v387_v23 = vpop.permute.xlu1 %386 }
  0xac   :  { %v230_v37 = vpop.f32.mrf.mxu0 }
  0xad   :  { %v231_v38 = vadd.f32 %v230_v37, %v97_v17  ;;  %v874_v17 = vld [vmem:[%s1274_s3 + $0x10] sm:$0xff] }
  0xaf   :  { %v268_v40 = vmax.f32 %v231_v38, 0.0  ;;  %v377_v24 = vpop.permute.xlu0 %376 }
  0xb1   :  { %v297_v41 = vpack.c.bf16 %v268_v40, %v267_v39  ;;  %v362_v25 = vpop.permute.xlu1 %361 }
  0xb4   :  { %v233_v42 = vpop.f32.mrf.mxu0 }
  0xb5   :  { %v234_v43 = vadd.f32 %v233_v42, %v102_v12 }
  0xb7   :  { %v269_v46 = vmax.f32 %v234_v43, 0.0  ;;  %v352_v27 = vpop.permute.xlu0 %351  ;;  %v342_v43 = vpop.permute.xlu2 %341 }
  0xb9   :  { %v357_v28 = vpop.permute.xlu1 %356 }
  0xbc   :  { %v236_v44 = vpop.f32.mrf.mxu0 }
  0xbd   :  { %v237_v45 = vadd.f32 %v236_v44, %v107_v16  ;;  %v879_v16 = vld [vmem:[%s1274_s3 + $0x38] sm:$0xff] }
  0xbf   :  { %v270_v47 = vmax.f32 %v237_v45, 0.0  ;;  %v347_v30 = vpop.permute.xlu0 %346 }
  0xc1   :  { %v298_v48 = vpack.c.bf16 %v270_v47, %v269_v46 }
  0xc4   :  { %v239_v49 = vpop.f32.mrf.mxu0 }
  0xc5   :  { %v240_v15 = vadd.f32 %v239_v49, %v112_v13  ;;  %v878_v13 = vld [vmem:[%s1274_s3 + $0x30] sm:$0xff] }
  0xc7   :  { %v322_v34 = vpop.permute.xlu0 %321 }
  0xcc   :  { %v242_v50 = vpop.f32.mrf.mxu0 }
  0xcd   :  { %v243_v10 = vadd.f32 %v242_v50, %v117_v14  ;;  %v873_v14 = vld [vmem:[%s1274_s3 + $0x8] sm:$0xff] }
  0xd4   :  { %v245_v51 = vpop.f32.mrf.mxu0 }
  0xd5   :  { %v246_v5 = vadd.f32 %v245_v51, %v1181_v61  ;;  %v872_v61 = vld [vmem:[%s1274_s3] sm:$0xff] }
  0xdc   :  { %v248_v52 = vpop.f32.mrf.mxu0 }
  0xdd   :  { %v249_v0 = vadd.f32 %v248_v52, %v127_v6 }
  0xdf   :  { %v274_v11 = vmax.f32 %v249_v0, 0.0 }
  0xe4   :  { %v251_v53 = vpop.f32.mrf.mxu0 }
  0xe5   :  { %v252_v60 = vadd.f32 %v251_v53, %v1195_v2  ;;  %v271_v2 = vmax.f32 %v240_v15, 0.0 }
  0xe7   :  { %v275_v7 = vmax.f32 %v252_v60, 0.0 }
  0xec   :  { %v254_v54 = vpop.f32.mrf.mxu0 }
  0xed   :  { %v255_v58 = vadd.f32 %v254_v54, %v137_v9 }
  0xef   :  { %v276_v3 = vmax.f32 %v255_v58, 0.0 }
  0xf1   :  { %v301_v12 = vpack.c.bf16 %v276_v3, %v275_v7 }
  0xf4   :  { %v257_v55 = vpop.f32.mrf.mxu0 }
  0xf5   :  { %v258_v56 = vadd.f32 %v257_v55, %v1192_v1  ;;  %v273_v1 = vmax.f32 %v246_v5, 0.0 }
  0xf7   :  { %v277_v62 = vmax.f32 %v258_v56, 0.0  ;;  %v300_v9 = vpack.c.bf16 %v274_v11, %v273_v1 }
  0xfc   :  { %v260_v57 = vpop.f32.mrf.mxu0 }
  0xfd   :  { %v261_v59 = vadd.f32 %v260_v57, %v147_v8  ;;  %v272_v8 = vmax.f32 %v243_v10, 0.0 }
  0xff   :  { %v278_v63 = vmax.f32 %v261_v59, 0.0  ;;  %v299_v6 = vpack.c.bf16 %v272_v8, %v271_v2 }
 0x101   :  { %v302_v4 = vpack.c.bf16 %v278_v63, %v277_v62 }
 0x103   :  { %447 = vmatpush.bf16.msra.mxu1 %v302_v4  ;;  %888 = vmatpush.bf16.msra.mxu3 %v302_v4 }
 0x107   :  { %448 = vmatpush.bf16.msra.mxu1 %v301_v12  ;;  %889 = vmatpush.bf16.msra.mxu3 %v301_v12 }
 0x10b   :  { %449 = vmatpush.bf16.msra.mxu1 %v300_v9  ;;  %890 = vmatpush.bf16.msra.mxu3 %v300_v9 }
 0x10f   :  { %450 = vmatpush.bf16.msra.mxu1 %v299_v6  ;;  %891 = vmatpush.bf16.msra.mxu3 %v299_v6 }
 0x113   :  { %451 = vmatpush.bf16.msra.mxu1 %v298_v48  ;;  %892 = vmatpush.bf16.msra.mxu3 %v298_v48  ;;  %v337_v48 = vpop.permute.xlu2 %336 }
 0x117   :  { %452 = vmatpush.bf16.msra.mxu1 %v297_v41  ;;  %893 = vmatpush.bf16.msra.mxu3 %v297_v41 }
 0x11b   :  { %453 = vmatpush.bf16.msra.mxu1 %v296_v31  ;;  %894 = vmatpush.bf16.msra.mxu3 %v296_v31  ;;  %v332_v31 = vpop.permute.xlu1 %331 }
 0x11f   :  { %454 = vmatpush.bf16.msra.mxu1 %v295_v35  ;;  %895 = vmatpush.bf16.msra.mxu3 %v295_v35 }
 0x122   :  { %455 = vmatmul.bf16.vlgmr.msra.gmra.mxu1 %v872_v61  ;;  %485 = vmatmul.bf16.vlgmr.msra.gmra.mxu3 %v878_v13 }
 0x123   :  { %v327_v37 = vpop.permute.xlu1 %326 }
 0x132   :  { %460 = vmatmul.bf16.gmra.mxu1 %v873_v14  ;;  %490 = vmatmul.bf16.gmra.mxu3 %v879_v16 }
 0x142   :  { %465 = vmatmul.bf16.gmra.mxu1 %v874_v17 }
 0x152   :  { %470 = vmatmul.bf16.gmra.mxu1 %v875_v18 }
 0x162   :  { %475 = vmatmul.bf16.gmra.mxu1 %v876_v19 }
 0x172   :  { %480 = vmatmul.bf16.gmra.mxu1 %v877_v20 }
 0x19f   :  { %v456_v32 = vpop.f32.mrf.mxu1 }
 0x1a0   :  { %v457_v36 = vadd.f32 %v456_v32, %v322_v34  ;;  %v887_v32 = vld [vmem:[%s1276_s5 + $0x38] sm:$0xff] }
 0x1a1   :  { %v883_v34 = vld [vmem:[%s1276_s5 + $0x18] sm:$0xff] }
 0x1a2   :  { %v496_v40 = vmax.f32 %v457_v36, 0.0  ;;  %v885_v36 = vld [vmem:[%s1276_s5 + $0x28] sm:$0xff] }
 0x1a5   :  { %v486_v35 = vpop.f32.mrf.mxu3 }
 0x1a6   :  { %v487_v59 = vadd.f32 %v486_v35, %v382_v22  ;;  %v884_v35 = vld [vmem:[%s1276_s5 + $0x20] sm:$0xff] }
 0x1a7   :  { %v458_v38 = vpop.f32.mrf.mxu1 }
 0x1a8   :  { %v459_v39 = vadd.f32 %v458_v38, %v327_v37  ;;  %v508_v3 = vmax.f32 %v487_v59, 0.0  ;;  %v625_v37 = vpop.permute.xlu2 %624  ;;  %v615_v38 = vpop.permute.xlu1 %614 }
 0x1aa   :  { %v497_v41 = vmax.f32 %v459_v39, 0.0 }
 0x1ac   :  { %v1237_v42 = vpack.c.bf16 %v497_v41, %v496_v40 }
 0x1ad   :  { %v488_v44 = vpop.f32.mrf.mxu3 }
 0x1ae   :  { %v489_v56 = vadd.f32 %v488_v44, %v387_v23 }
 0x1af   :  { %v461_v45 = vpop.f32.mrf.mxu1 }
 0x1b0   :  { %v462_v47 = vadd.f32 %v461_v45, %v332_v31  ;;  %v509_v63 = vmax.f32 %v489_v56, 0.0  ;;  %v620_v39 = vpop.permute.xlu2 %619  ;;  %v610_v40 = vpop.permute.xlu1 %609 }
 0x1b2   :  { %v498_v51 = vmax.f32 %v462_v47, 0.0  ;;  %v534_v4 = vpack.c.bf16 %v509_v63, %v508_v3 }
 0x1b5   :  { %v491_v46 = vpop.f32.mrf.mxu3 }
 0x1b6   :  { %v492_v53 = vadd.f32 %v491_v46, %v392_v21 }
 0x1b7   :  { %v463_v49 = vpop.f32.mrf.mxu1 }
 0x1b8   :  { %v464_v50 = vadd.f32 %v463_v49, %v337_v48  ;;  %v510_v60 = vmax.f32 %v492_v53, 0.0  ;;  %v595_v41 = vpop.permute.xlu2 %594 }
 0x1ba   :  { %v499_v52 = vmax.f32 %v464_v50, 0.0 }
 0x1bc   :  { %v529_v54 = vpack.c.bf16 %v499_v52, %v498_v51 }
 0x1bd   :  { %v493_v55 = vpop.f32.mrf.mxu3 }
 0x1be   :  { %v494_v57 = vadd.f32 %v493_v55, %v397_v26 }
 0x1bf   :  { %v466_v58 = vpop.f32.mrf.mxu1 }
 0x1c0   :  { %v511_v62 = vmax.f32 %v494_v57, 0.0  ;;  %v467_v23 = vadd.f32 %v466_v58, %v342_v43  ;;  %v585_v43 = vpop.permute.xlu1 %584  ;;  %v590_v44 = vpop.permute.xlu2 %589 }
 0x1c2   :  { %v535_v0 = vpack.c.bf16 %v511_v62, %v510_v60 }
 0x1c4   :  { %680 = vmatpush.bf16.msra.mxu2 %v535_v0  ;;  %896 = vmatpush.bf16.msrb.mxu3 %v535_v0 }
 0x1c7   :  { %v468_v5 = vpop.f32.mrf.mxu1 }
 0x1c8   :  { %681 = vmatpush.bf16.msra.mxu2 %v534_v4  ;;  %897 = vmatpush.bf16.msrb.mxu3 %v534_v4  ;;  %v469_v20 = vadd.f32 %v468_v5, %v347_v30  ;;  %v881_v30 = vld [vmem:[%s1276_s5 + $0x8] sm:$0xff]  ;;  %v580_v46 = vpop.permute.xlu1 %579  ;;  %v565_v47 = vpop.permute.xlu2 %564 }
 0x1cf   :  { %v471_v7 = vpop.f32.mrf.mxu1 }
 0x1d0   :  { %v472_v18 = vadd.f32 %v471_v7, %v352_v27  ;;  %v880_v27 = vld [vmem:[%s1276_s5] sm:$0xff]  ;;  %v555_v51 = vpop.permute.xlu1 %554  ;;  %v560_v52 = vpop.permute.xlu2 %559 }
 0x1d2   :  { %v502_v26 = vmax.f32 %v472_v18, 0.0 }
 0x1d7   :  { %v473_v10 = vpop.f32.mrf.mxu1 }
 0x1d8   :  { %v474_v14 = vadd.f32 %v473_v10, %v357_v28  ;;  %v886_v28 = vld [vmem:[%s1276_s5 + $0x30] sm:$0xff] }
 0x1da   :  { %v503_v21 = vmax.f32 %v474_v14, 0.0 }
 0x1dc   :  { %v531_v31 = vpack.c.bf16 %v503_v21, %v502_v26 }
 0x1df   :  { %v476_v11 = vpop.f32.mrf.mxu1 }
 0x1e0   :  { %v477_v6 = vadd.f32 %v476_v11, %v362_v25 }
 0x1e2   :  { %v504_v19 = vmax.f32 %v477_v6, 0.0 }
 0x1e7   :  { %v478_v12 = vpop.f32.mrf.mxu1 }
 0x1e8   :  { %v479_v9 = vadd.f32 %v478_v12, %v367_v33  ;;  %v882_v33 = vld [vmem:[%s1276_s5 + $0x10] sm:$0xff] }
 0x1ea   :  { %v505_v16 = vmax.f32 %v479_v9, 0.0 }
 0x1ec   :  { %v532_v22 = vpack.c.bf16 %v505_v16, %v504_v19 }
 0x1ef   :  { %v481_v15 = vpop.f32.mrf.mxu1 }
 0x1f0   :  { %v482_v1 = vadd.f32 %v481_v15, %v372_v29  ;;  %v501_v29 = vmax.f32 %v469_v20, 0.0 }
 0x1f2   :  { %v506_v61 = vmax.f32 %v482_v1, 0.0 }
 0x1f7   :  { %v483_v8 = vpop.f32.mrf.mxu1 }
 0x1f8   :  { %v484_v2 = vadd.f32 %v483_v8, %v377_v24  ;;  %v500_v24 = vmax.f32 %v467_v23, 0.0 }
 0x1fa   :  { %v507_v13 = vmax.f32 %v484_v2, 0.0  ;;  %v530_v25 = vpack.c.bf16 %v501_v29, %v500_v24 }
 0x1fc   :  { %v533_v17 = vpack.c.bf16 %v507_v13, %v506_v61 }
 0x1fe   :  { %682 = vmatpush.bf16.msra.mxu2 %v533_v17  ;;  %898 = vmatpush.bf16.msrb.mxu3 %v533_v17 }
 0x202   :  { %683 = vmatpush.bf16.msra.mxu2 %v532_v22  ;;  %899 = vmatpush.bf16.msrb.mxu3 %v532_v22 }
 0x206   :  { %684 = vmatpush.bf16.msra.mxu2 %v531_v31  ;;  %900 = vmatpush.bf16.msrb.mxu3 %v531_v31 }
 0x20a   :  { %685 = vmatpush.bf16.msra.mxu2 %v530_v25  ;;  %901 = vmatpush.bf16.msrb.mxu3 %v530_v25 }
 0x20e   :  { %686 = vmatpush.bf16.msra.mxu2 %v529_v54  ;;  %902 = vmatpush.bf16.msrb.mxu3 %v529_v54 }
 0x212   :  { %687 = vmatpush.bf16.msra.mxu2 %v1237_v42  ;;  %903 = vmatpush.bf16.msrb.mxu3 %v1237_v42  ;;  %v630_v42 = vpop.permute.xlu0 %629 }
 0x215   :  { %688 = vmatmul.bf16.vlgmr.msra.gmra.mxu2 %v880_v27  ;;  %718 = vmatmul.bf16.vlgmr.msrb.gmra.mxu3 %v886_v28 }
 0x21a   :  { %v605_v45 = vpop.permute.xlu0 %604 }
 0x222   :  { %v600_v50 = vpop.permute.xlu0 %599 }
 0x225   :  { %693 = vmatmul.bf16.gmra.mxu2 %v881_v30  ;;  %723 = vmatmul.bf16.gmra.mxu3 %v887_v32 }
 0x22a   :  { %v575_v59 = vpop.permute.xlu0 %574 }
 0x232   :  { %v570_v0 = vpop.permute.xlu0 %569 }
 0x235   :  { %698 = vmatmul.bf16.gmra.mxu2 %v882_v33 }
 0x245   :  { %703 = vmatmul.bf16.gmra.mxu2 %v883_v34 }
 0x255   :  { %708 = vmatmul.bf16.gmra.mxu2 %v884_v35 }
 0x265   :  { %713 = vmatmul.bf16.gmra.mxu2 %v885_v36 }
 0x298   :  { %v689_v48 = vpop.f32.mrf.mxu2  ;;  %v719_v49 = vpop.f32.mrf.mxu3 }
 0x299   :  { %v690_v53 = vadd.f32 %v689_v48, %v555_v51  ;;  %v720_v15 = vadd.f32 %v719_v49, %v615_v38 }
 0x29b   :  { %v729_v57 = vmax.f32 %v690_v53, 0.0  ;;  %v741_v14 = vmax.f32 %v720_v15, 0.0 }
 0x2a0   :  { %v691_v54 = vpop.f32.mrf.mxu2  ;;  %v721_v55 = vpop.f32.mrf.mxu3 }
 0x2a1   :  { %v692_v56 = vadd.f32 %v691_v54, %v560_v52  ;;  %v722_v10 = vadd.f32 %v721_v55, %v620_v39 }
 0x2a3   :  { %v730_v58 = vmax.f32 %v692_v56, 0.0  ;;  %v742_v6 = vmax.f32 %v722_v10, 0.0 }
 0x2a5   :  { %v746_v60 = vpack.c.bf16 %v730_v58, %v729_v57  ;;  %v752_v17 = vpack.c.bf16 %v742_v6, %v741_v14 }
 0x2a8   :  { %v694_v62 = vpop.f32.mrf.mxu2  ;;  %v724_v63 = vpop.f32.mrf.mxu3 }
 0x2a9   :  { %v695_v3 = vadd.f32 %v694_v62, %v565_v47  ;;  %v725_v4 = vadd.f32 %v724_v63, %v625_v37 }
 0x2ab   :  { %v731_v1 = vmax.f32 %v695_v3, 0.0  ;;  %v743_v8 = vmax.f32 %v725_v4, 0.0 }
 0x2b0   :  { %v696_v5 = vpop.f32.mrf.mxu2  ;;  %v726_v7 = vpop.f32.mrf.mxu3 }
 0x2b1   :  { %v697_v11 = vadd.f32 %v696_v5, %v570_v0  ;;  %v727_v12 = vadd.f32 %v726_v7, %v630_v42 }
 0x2b3   :  { %v732_v9 = vmax.f32 %v697_v11, 0.0  ;;  %v744_v2 = vmax.f32 %v727_v12, 0.0 }
 0x2b5   :  { %v747_v61 = vpack.c.bf16 %v732_v9, %v731_v1  ;;  %v753_v13 = vpack.c.bf16 %v744_v2, %v743_v8 }
 0x2b7   :  { %754 = vmatpush.bf16.msra.mxu3 %v753_v13 }
 0x2b8   :  { %v699_v16 = vpop.f32.mrf.mxu2 }
 0x2b9   :  { %v700_v39 = vadd.f32 %v699_v16, %v575_v59 }
 0x2bb   :  { %755 = vmatpush.bf16.msra.mxu3 %v752_v17  ;;  %v733_v48 = vmax.f32 %v700_v39, 0.0 }
 0x2c0   :  { %v701_v18 = vpop.f32.mrf.mxu2 }
 0x2c1   :  { %v702_v36 = vadd.f32 %v701_v18, %v580_v46 }
 0x2c3   :  { %v734_v47 = vmax.f32 %v702_v36, 0.0 }
 0x2c8   :  { %v704_v19 = vpop.f32.mrf.mxu2 }
 0x2c9   :  { %v705_v34 = vadd.f32 %v704_v19, %v585_v43  ;;  %v771_v43 = vpop.permute.xlu0 %770 }
 0x2cb   :  { %v735_v42 = vmax.f32 %v705_v34, 0.0 }
 0x2d0   :  { %v706_v20 = vpop.f32.mrf.mxu2 }
 0x2d1   :  { %v707_v30 = vadd.f32 %v706_v20, %v590_v44  ;;  %v773_v44 = vperm.slane %v771_v43, 0 }
 0x2d3   :  { %v736_v37 = vmax.f32 %v707_v30, 0.0 }
 0x2d8   :  { %v709_v21 = vpop.f32.mrf.mxu2 }
 0x2d9   :  { %v710_v25 = vadd.f32 %v709_v21, %v595_v41  ;;  %v745_v41 = vld [vmem:[%s1278_s7] sm:$0xf] }
 0x2db   :  { %v737_v35 = vmax.f32 %v710_v25, 0.0 }
 0x2e0   :  { %v711_v22 = vpop.f32.mrf.mxu2 }
 0x2e1   :  { %v712_v31 = vadd.f32 %v711_v22, %v600_v50 }
 0x2e3   :  { %v738_v32 = vmax.f32 %v712_v31, 0.0 }
 0x2e5   :  { %v750_v38 = vpack.c.bf16 %v738_v32, %v737_v35 }
 0x2e8   :  { %v714_v23 = vpop.f32.mrf.mxu2 }
 0x2e9   :  { %v715_v26 = vadd.f32 %v714_v23, %v605_v45  ;;  %v749_v45 = vpack.c.bf16 %v736_v37, %v735_v42 }
 0x2eb   :  { %v739_v27 = vmax.f32 %v715_v26, 0.0 }
 0x2f0   :  { %v716_v29 = vpop.f32.mrf.mxu2 }
 0x2f1   :  { %v717_v24 = vadd.f32 %v716_v29, %v610_v40  ;;  %v748_v40 = vpack.c.bf16 %v734_v47, %v733_v48 }
 0x2f3   :  { %v740_v28 = vmax.f32 %v717_v24, 0.0 }
 0x2f5   :  { %v751_v33 = vpack.c.bf16 %v740_v28, %v739_v27 }
 0x2f7   :  { %756 = vmatpush.bf16.msra.mxu3 %v751_v33 }
 0x2fb   :  { %757 = vmatpush.bf16.msra.mxu3 %v750_v38 }
 0x2ff   :  { %758 = vmatpush.bf16.msra.mxu3 %v749_v45 }
 0x303   :  { %759 = vmatpush.bf16.msra.mxu3 %v748_v40 }
 0x307   :  { %760 = vmatpush.bf16.msra.mxu3 %v747_v61 }
 0x30b   :  { %761 = vmatpush.bf16.msra.mxu3 %v746_v60 }
 0x30e   :  { %762 = vmatmul.bf16.vlgmr.msra.gmra.mxu3 %v745_v41 }
 0x391   :  { %v763_v46 = vpop.f32.mrf.mxu3 }
 0x392   :  { %v774_v49 = vadd.f32 %v773_v44, %v763_v46 }
 0x394   :  { %775 = vst [vmem:[#allocation3] sm:$0x1] %v774_v49 }
 0x395   :  { %786 = dma.vmem_to_hbm [thread:$0]  %s782_s24, 16, %s784_s27, [#allocation4]  }
 0x399   :  { %v765_v50 = vpop.f32.mrf.mxu3 }
 0x39a   :  { %933 = dma.done.wait [#allocation4], 16  }
 0x39b   :  { %934 = vsyncadd [#allocation4], 4294967280 }
 0x39c   :  { %791 = vsyncpa [#allocation4], 1 }

</bundles_post_ra>
